<compile_context>
chip_gen: v7x
topology: tpu7x:2x2x1
jax: 0.10.0
libtpu: 0.0.40
codegen_flags: <defaults>
</compile_context>

<pallas_src>
import functools

import jax
import jax.numpy as jnp
from jax.experimental import pallas as pl
from jax.experimental.pallas import tpu as pltpu

_LANES = 128
_SUBLANES = 8
# 8192x128 f32 = 4 MiB per input per pipeline buffer; 3 inputs x 2 buffers =
# 24 MiB live -> per-step DMA is long enough to hide the fixed grid-step
# overhead even at v7x's ~3.2 TB/s HBM.  Well inside physical VMEM everywhere
# (128 MiB v5e/v6e, 64 MiB v7x); we raise the scoped limit explicitly below.
_MAX_TILE_ROWS = 8192
_MAX_CORE_SPLITS = 2     # v7x has 2 TensorCores per chip; v5e/v6e have 1.


def _round_up(x, m):
    return (x + m - 1) // m * m


def _sublane_multiple(dtype):
    # f32 -> 8 rows per vreg, bf16 -> 16, int8/fp8 -> 32 (packed sublanes).
    itemsize = jnp.dtype(dtype).itemsize
    return _SUBLANES * max(1, 4 // itemsize)


def _num_tensorcores():
    """Best-effort TensorCores-per-chip (v7x: 2, v5e/v6e: 1). Never raises."""
    try:
        info = pltpu.get_tpu_info()
        for attr in ("num_cores", "num_tensorcores", "tensorcore_count",
                     "num_cores_per_chip", "cores_per_chip"):
            v = getattr(info, attr, None)
            if isinstance(v, int) and 1 <= v <= 16:
                return v
    except Exception:
        pass
    try:
        kind = jax.devices()[0].device_kind.lower()
        if "v7" in kind:
            return 2
    except Exception:
        pass
    return 1


def _myloss_kernel(x_ref, y_ref, w_ref, o_ref, *,
                   epsilon, rows, tile_rows, tiles_per_core):
    c = pl.program_id(0)   # core-split index ("parallel")
    i = pl.program_id(1)   # row-tile index within this split ("arbitrary")

    # Zero this split's resident (8,128) vector accumulator on its first step.
    @pl.when(i == 0)
    def _():
        o_ref[...] = jnp.zeros_like(o_ref)

    def weighted_entropy():
        x = x_ref[...].astype(jnp.float32)
        y = y_ref[...].astype(jnp.float32)
        w = w_ref[...].astype(jnp.float32)
        # TODO(synk): if labels are guaranteed hard {0,1}, a single
        # log(where(y>0.5, x+eps, 1-x+eps)) halves EUP work; not applied since
        # the reference module also supports soft labels.
        ent = (-y * jnp.log(x + epsilon)
               - (1.0 - y) * jnp.log(1.0 - x + epsilon))
        return ent * w

    def accumulate(ew):
        # Partial reduction to one vreg: sum groups of 8 rows -> (8, 128).
        # Pure VPU vreg adds; the cross-sublane/cross-lane reduce and the
        # final *0.5 happen once in the wrapper, outside the hot loop.
        partial = ew.reshape(tile_rows // _SUBLANES, _SUBLANES, _LANES).sum(axis=0)
        o_ref[...] += partial.reshape(o_ref.shape)

    # Row offset of this tile, computed from the *unclamped* tile index so the
    # fully-duplicated clamped tile of an uneven core split masks to zero.
    row_start = (c * tiles_per_core + i) * tile_rows
    is_full = row_start + tile_rows <= rows

    # Hot path: interior tiles need no iota/compare/select at all.
    @pl.when(is_full)
    def _():
        accumulate(weighted_entropy())

    # Boundary (and duplicate) tiles: rows past `rows` hold garbage and may
    # produce NaN/Inf in the entropy; a single select on the product discards
    # them (select does not propagate NaNs from the unselected branch).
    @pl.when(jnp.logical_not(is_full))
    def _():
        ew = weighted_entropy()
        row_ids = jax.lax.broadcasted_iota(jnp.int32, ew.shape, 0) + row_start
        accumulate(jnp.where(row_ids < rows, ew, 0.0))


def myloss(input_, label, weight, epsilon=1e-08):
    """Returns scalar f32: sum((-y*log(x+eps) - (1-y)*log(1-x+eps)) * w) / 2."""
    assert input_.shape == label.shape == weight.shape
    n = input_.size

    x = input_.reshape(-1)
    y = label.reshape(-1)
    w = weight.reshape(-1)

    # Lane-unaligned sizes: do NOT jnp.pad full copies of all three operands.
    # The kernel covers the 128-aligned prefix (pure reshape, no copy in the
    # common aligned case) and the <128-element ragged tail is folded in with
    # a tiny wrapper-side reduction.
    n_aligned = (n // _LANES) * _LANES
    tail_sum = jnp.float32(0.0)
    if n_aligned != n:
        xt = x[n_aligned:].astype(jnp.float32)
        yt = y[n_aligned:].astype(jnp.float32)
        wt = w[n_aligned:].astype(jnp.float32)
        ent_t = (-yt * jnp.log(xt + epsilon)
                 - (1.0 - yt) * jnp.log(1.0 - xt + epsilon))
        tail_sum = jnp.sum(ent_t * wt)
        x, y, w = x[:n_aligned], y[:n_aligned], w[:n_aligned]

    if n_aligned == 0:
        return tail_sum * 0.5

    rows = n_aligned // _LANES
    x2 = x.reshape(rows, _LANES)
    y2 = y.reshape(rows, _LANES)
    w2 = w.reshape(rows, _LANES)

    sub_mult = max(_sublane_multiple(a.dtype) for a in (x2, y2, w2))
    tile_rows = min(_MAX_TILE_ROWS, _round_up(rows, sub_mult))
    tiles_total = pl.cdiv(rows, tile_rows)

    # Split row-tiles across TensorCores only when the chip actually has more
    # than one (v7x) and there is enough work; on 1-TC v5e/v6e the extra split
    # is pure overhead (duplicated clamped tile + extra accumulator).
    num_splits = min(_num_tensorcores(), _MAX_CORE_SPLITS, tiles_total)
    tiles_per_core = pl.cdiv(tiles_total, num_splits)

    def in_map(c, i):
        # Clamp so the DMA block index stays in range; the fully out-of-range
        # duplicate tile is zeroed by the in-kernel row mask.
        t = jnp.minimum(c * tiles_per_core + i, tiles_total - 1)
        return (t, 0)

    tile_spec = pl.BlockSpec((tile_rows, _LANES), in_map)
    out_spec = pl.BlockSpec((1, _SUBLANES, _LANES), lambda c, i: (c, 0, 0))

    in_bytes = sum(int(a.size) * a.dtype.itemsize for a in (x2, y2, w2))
    out_bytes = num_splits * _SUBLANES * _LANES * 4
    # Double-buffered input tiles dominate the scoped-VMEM budget; raise the
    # limit above v5e's 16 MiB default but stay far below physical VMEM.
    vmem_needed = 2 * tile_rows * _LANES * sum(
        a.dtype.itemsize for a in (x2, y2, w2)) + 2 * out_bytes
    vmem_limit = int(min(max(vmem_needed + (4 << 20), 16 << 20), 48 << 20))

    out = pl.pallas_call(
        functools.partial(
            _myloss_kernel,
            epsilon=epsilon,
            rows=rows,
            tile_rows=tile_rows,
            tiles_per_core=tiles_per_core,
        ),
        out_shape=jax.ShapeDtypeStruct(
            (num_splits, _SUBLANES, _LANES), jnp.float32),
        grid_spec=pltpu.PrefetchScalarGridSpec(
            num_scalar_prefetch=0,
            grid=(num_splits, tiles_per_core),
            in_specs=[tile_spec, tile_spec, tile_spec],
            out_specs=out_spec,
        ),
        compiler_params=pltpu.CompilerParams(
            dimension_semantics=("parallel", "arbitrary"),
            vmem_limit_bytes=vmem_limit),
        cost_estimate=pl.CostEstimate(
            flops=8 * n_aligned,
            transcendentals=2 * n_aligned,
            bytes_accessed=in_bytes + out_bytes),
    )(x2, y2, w2)

    # Final cross-lane reduce over the per-core (8,128) accumulators, the tail
    # contribution and the /2, done once here (tiny XLA reduction).
    return (jnp.sum(out) + tail_sum) * 0.5


def myloss_ref(input_, label, weight, epsilon=1e-08):
    entropy = (-label * jnp.log(input_ + epsilon)
               - (1.0 - label) * jnp.log(1.0 - input_ + epsilon))
    return jnp.sum(entropy * weight) / 2


if __name__ == "__main__":
    key = jax.random.PRNGKey(0)
    k1, k2, k3, k4, k5, k6 = jax.random.split(key, 6)

    # Shapes typical of the GVB use-case: per-sample class probabilities.
    shape = (2, 4, 16, 16)
    input_ = jax.random.uniform(k1, shape, jnp.float32, 1e-3, 1.0 - 1e-3)
    label = (jax.random.uniform(k2, shape, jnp.float32) > 0.5).astype(jnp.float32)
    weight = jax.random.uniform(k3, shape, jnp.float32)

    out = jax.block_until_ready(myloss(input_, label, weight))
    ref = myloss_ref(input_, label, weight)
    assert jnp.allclose(out, ref, rtol=1e-5, atol=1e-5), (out, ref)

    # Lane-unaligned size: exercises the no-pad ragged-tail path and the
    # masked boundary tile.
    shape2 = (4, 100)   # 400 elements -> 3 aligned rows + 16-element tail
    input2 = jax.random.uniform(k4, shape2, jnp.float32, 1e-3, 1.0 - 1e-3)
    label2 = (jax.random.uniform(k5, shape2, jnp.float32) > 0.5).astype(jnp.float32)
    weight2 = jax.random.uniform(k6, shape2, jnp.float32)

    out2 = jax.block_until_ready(myloss(input2, label2, weight2))
    ref2 = myloss_ref(input2, label2, weight2)
    assert jnp.allclose(out2, ref2, rtol=1e-5, atol=1e-5), (out2, ref2)

    print("KERNEL_OK")
</pallas_src>

<mosaic_0001>
module attributes {stable_mosaic.version = 11 : i64} {
  func.func @_myloss_kernel(%arg0: i32, %arg1: i32, %arg2: memref<16x128xf32, #tpu.memory_space<vmem>>, %arg3: memref<16x128xf32, #tpu.memory_space<vmem>>, %arg4: memref<16x128xf32, #tpu.memory_space<vmem>>, %arg5: memref<1x8x128xf32, #tpu.memory_space<vmem>>) attributes {dimension_semantics = [#tpu.dimension_semantics<parallel>, #tpu.dimension_semantics<arbitrary>], iteration_bounds = array<i64: 1, 1>, scalar_prefetch = 0 : i64, scratch_operands = 0 : i64, tpu.core_type = #tpu.core_type<tc>, window_params = [{transform_indices = @transform_0, window_bounds = array<i64: 16, 128>}, {transform_indices = @transform_1, window_bounds = array<i64: 16, 128>}, {transform_indices = @transform_2, window_bounds = array<i64: 16, 128>}, {transform_indices = @transform_3, window_bounds = array<i64: 1, 8, 128>}]} {
    %c0_i32 = arith.constant 0 : i32
    %0 = arith.cmpi eq, %arg1, %c0_i32 : i32
    %1 = arith.extui %0 : i1 to i32
    %c0_i32_0 = arith.constant 0 : i32
    %2 = arith.cmpi ne, %1, %c0_i32_0 : i32
    scf.if %2 {
      %cst = arith.constant 0.000000e+00 : f32
      %13 = vector.broadcast %cst : f32 to vector<1x8x128xf32>
      %c0 = arith.constant 0 : index
      %c0_5 = arith.constant 0 : index
      %c0_6 = arith.constant 0 : index
      %14 = vector.load %arg5[%c0, %c0_5, %c0_6] : memref<1x8x128xf32, #tpu.memory_space<vmem>>, vector<1x8x128xf32>
      tpu.vector_store %arg5[%c0, %c0_5, %c0_6], %13 {strides = array<i32>} : memref<1x8x128xf32, #tpu.memory_space<vmem>>, vector<1x8x128xf32>,
    } else {
    }
    %c1_i32 = arith.constant 1 : i32
    %3 = arith.muli %arg0, %c1_i32 : i32
    %4 = arith.addi %3, %arg1 : i32
    %c16_i32 = arith.constant 16 : i32
    %5 = arith.muli %4, %c16_i32 : i32
    %c16_i32_1 = arith.constant 16 : i32
    %6 = arith.addi %5, %c16_i32_1 : i32
    %c16_i32_2 = arith.constant 16 : i32
    %7 = arith.cmpi sle, %6, %c16_i32_2 : i32
    %8 = arith.extui %7 : i1 to i32
    %c0_i32_3 = arith.constant 0 : i32
    %9 = arith.cmpi ne, %8, %c0_i32_3 : i32
    scf.if %9 {
      %c0 = arith.constant 0 : index
      %c0_5 = arith.constant 0 : index
      %13 = vector.load %arg2[%c0, %c0_5] : memref<16x128xf32, #tpu.memory_space<vmem>>, vector<16x128xf32>
      %c0_6 = arith.constant 0 : index
      %c0_7 = arith.constant 0 : index
      %14 = vector.load %arg3[%c0_6, %c0_7] : memref<16x128xf32, #tpu.memory_space<vmem>>, vector<16x128xf32>
      %c0_8 = arith.constant 0 : index
      %c0_9 = arith.constant 0 : index
      %15 = vector.load %arg4[%c0_8, %c0_9] : memref<16x128xf32, #tpu.memory_space<vmem>>, vector<16x128xf32>
      %cst = arith.constant 0.000000e+00 : f32
      %16 = vector.broadcast %cst : f32 to vector<16x128xf32>
      %17 = arith.subf %16, %14 : vector<16x128xf32>
      %cst_10 = arith.constant 9.99999993E-9 : f32
      %18 = vector.broadcast %cst_10 : f32 to vector<16x128xf32>
      %19 = arith.addf %13, %18 : vector<16x128xf32>
      %20 = math.log %19 : vector<16x128xf32>
      %21 = arith.mulf %17, %20 : vector<16x128xf32>
      %cst_11 = arith.constant 1.000000e+00 : f32
      %22 = vector.broadcast %cst_11 : f32 to vector<16x128xf32>
      %23 = arith.subf %22, %14 : vector<16x128xf32>
      %cst_12 = arith.constant 1.000000e+00 : f32
      %24 = vector.broadcast %cst_12 : f32 to vector<16x128xf32>
      %25 = arith.subf %24, %13 : vector<16x128xf32>
      %cst_13 = arith.constant 9.99999993E-9 : f32
      %26 = vector.broadcast %cst_13 : f32 to vector<16x128xf32>
      %27 = arith.addf %25, %26 : vector<16x128xf32>
      %28 = math.log %27 : vector<16x128xf32>
      %29 = arith.mulf %23, %28 : vector<16x128xf32>
      %30 = arith.subf %21, %29 : vector<16x128xf32>
      %31 = arith.mulf %30, %15 : vector<16x128xf32>
      %32 = vector.shape_cast %31 : vector<16x128xf32> to vector<2x8x128xf32>
      %cst_14 = arith.constant dense<0.000000e+00> : vector<8x128xf32>
      %33 = vector.multi_reduction <add>, %32, %cst_14 [0] : vector<2x8x128xf32> to vector<8x128xf32>
      %c0_15 = arith.constant 0 : index
      %c0_16 = arith.constant 0 : index
      %c0_17 = arith.constant 0 : index
      %34 = vector.load %arg5[%c0_15, %c0_16, %c0_17] : memref<1x8x128xf32, #tpu.memory_space<vmem>>, vector<1x8x128xf32>
      %35 = vector.shape_cast %33 : vector<8x128xf32> to vector<1x8x128xf32>
      %36 = arith.addf %34, %35 : vector<1x8x128xf32>
      %c0_18 = arith.constant 0 : index
      %c0_19 = arith.constant 0 : index
      %c0_20 = arith.constant 0 : index
      %37 = vector.load %arg5[%c0_18, %c0_19, %c0_20] : memref<1x8x128xf32, #tpu.memory_space<vmem>>, vector<1x8x128xf32>
      tpu.vector_store %arg5[%c0_18, %c0_19, %c0_20], %36 {strides = array<i32>} : memref<1x8x128xf32, #tpu.memory_space<vmem>>, vector<1x8x128xf32>,
    } else {
    }
    %true = arith.constant true
    %10 = arith.xori %7, %true : i1
    %11 = arith.extui %10 : i1 to i32
    %c0_i32_4 = arith.constant 0 : i32
    %12 = arith.cmpi ne, %11, %c0_i32_4 : i32
    scf.if %12 {
      %c0 = arith.constant 0 : index
      %c0_5 = arith.constant 0 : index
      %13 = vector.load %arg2[%c0, %c0_5] : memref<16x128xf32, #tpu.memory_space<vmem>>, vector<16x128xf32>
      %c0_6 = arith.constant 0 : index
      %c0_7 = arith.constant 0 : index
      %14 = vector.load %arg3[%c0_6, %c0_7] : memref<16x128xf32, #tpu.memory_space<vmem>>, vector<16x128xf32>
      %c0_8 = arith.constant 0 : index
      %c0_9 = arith.constant 0 : index
      %15 = vector.load %arg4[%c0_8, %c0_9] : memref<16x128xf32, #tpu.memory_space<vmem>>, vector<16x128xf32>
      %cst = arith.constant 0.000000e+00 : f32
      %16 = vector.broadcast %cst : f32 to vector<16x128xf32>
      %17 = arith.subf %16, %14 : vector<16x128xf32>
      %cst_10 = arith.constant 9.99999993E-9 : f32
      %18 = vector.broadcast %cst_10 : f32 to vector<16x128xf32>
      %19 = arith.addf %13, %18 : vector<16x128xf32>
      %20 = math.log %19 : vector<16x128xf32>
      %21 = arith.mulf %17, %20 : vector<16x128xf32>
      %cst_11 = arith.constant 1.000000e+00 : f32
      %22 = vector.broadcast %cst_11 : f32 to vector<16x128xf32>
      %23 = arith.subf %22, %14 : vector<16x128xf32>
      %cst_12 = arith.constant 1.000000e+00 : f32
      %24 = vector.broadcast %cst_12 : f32 to vector<16x128xf32>
      %25 = arith.subf %24, %13 : vector<16x128xf32>
      %cst_13 = arith.constant 9.99999993E-9 : f32
      %26 = vector.broadcast %cst_13 : f32 to vector<16x128xf32>
      %27 = arith.addf %25, %26 : vector<16x128xf32>
      %28 = math.log %27 : vector<16x128xf32>
      %29 = arith.mulf %23, %28 : vector<16x128xf32>
      %30 = arith.subf %21, %29 : vector<16x128xf32>
      %31 = arith.mulf %30, %15 : vector<16x128xf32>
      %32 = tpu.iota {dimensions = array<i32: 0>} : vector<16x128xi32>
      %33 = vector.broadcast %5 : i32 to vector<16x128xi32>
      %34 = arith.addi %32, %33 : vector<16x128xi32>
      %c16_i32_14 = arith.constant 16 : i32
      %35 = vector.broadcast %c16_i32_14 : i32 to vector<16x128xi32>
      %36 = arith.cmpi slt, %34, %35 : vector<16x128xi32>
      %cst_15 = arith.constant 0.000000e+00 : f32
      %37 = vector.broadcast %cst_15 : f32 to vector<16x128xf32>
      %38 = arith.select %36, %31, %37 : vector<16x128xi1>, vector<16x128xf32>
      %39 = vector.shape_cast %38 : vector<16x128xf32> to vector<2x8x128xf32>
      %cst_16 = arith.constant dense<0.000000e+00> : vector<8x128xf32>
      %40 = vector.multi_reduction <add>, %39, %cst_16 [0] : vector<2x8x128xf32> to vector<8x128xf32>
      %c0_17 = arith.constant 0 : index
      %c0_18 = arith.constant 0 : index
      %c0_19 = arith.constant 0 : index
      %41 = vector.load %arg5[%c0_17, %c0_18, %c0_19] : memref<1x8x128xf32, #tpu.memory_space<vmem>>, vector<1x8x128xf32>
      %42 = vector.shape_cast %40 : vector<8x128xf32> to vector<1x8x128xf32>
      %43 = arith.addf %41, %42 : vector<1x8x128xf32>
      %c0_20 = arith.constant 0 : index
      %c0_21 = arith.constant 0 : index
      %c0_22 = arith.constant 0 : index
      %44 = vector.load %arg5[%c0_20, %c0_21, %c0_22] : memref<1x8x128xf32, #tpu.memory_space<vmem>>, vector<1x8x128xf32>
      tpu.vector_store %arg5[%c0_20, %c0_21, %c0_22], %43 {strides = array<i32>} : memref<1x8x128xf32, #tpu.memory_space<vmem>>, vector<1x8x128xf32>,
    } else {
    }
    return
  }
  func.func @transform_0(%arg0: i32, %arg1: i32) -> (i32, i32) {
    %c1_i32 = arith.constant 1 : i32
    %0 = arith.muli %arg0, %c1_i32 : i32
    %1 = arith.addi %0, %arg1 : i32
    %c0_i32 = arith.constant 0 : i32
    %2 = arith.minsi %1, %c0_i32 : i32
    %c0_i32_0 = arith.constant 0 : i32
    %c0_i32_1 = arith.constant 0 : i32
    return %2, %c0_i32_0 : i32, i32
  }
  func.func @transform_1(%arg0: i32, %arg1: i32) -> (i32, i32) {
    %c1_i32 = arith.constant 1 : i32
    %0 = arith.muli %arg0, %c1_i32 : i32
    %1 = arith.addi %0, %arg1 : i32
    %c0_i32 = arith.constant 0 : i32
    %2 = arith.minsi %1, %c0_i32 : i32
    %c0_i32_0 = arith.constant 0 : i32
    %c0_i32_1 = arith.constant 0 : i32
    return %2, %c0_i32_0 : i32, i32
  }
  func.func @transform_2(%arg0: i32, %arg1: i32) -> (i32, i32) {
    %c1_i32 = arith.constant 1 : i32
    %0 = arith.muli %arg0, %c1_i32 : i32
    %1 = arith.addi %0, %arg1 : i32
    %c0_i32 = arith.constant 0 : i32
    %2 = arith.minsi %1, %c0_i32 : i32
    %c0_i32_0 = arith.constant 0 : i32
    %c0_i32_1 = arith.constant 0 : i32
    return %2, %c0_i32_0 : i32, i32
  }
  func.func @transform_3(%arg0: i32, %arg1: i32) -> (i32, i32, i32) {
    %c0_i32 = arith.constant 0 : i32
    %c0_i32_0 = arith.constant 0 : i32
    %c0_i32_1 = arith.constant 0 : i32
    return %arg0, %c0_i32, %c0_i32_0 : i32, i32, i32
  }
}

</mosaic_0001>

<bundles_post_ra>
// kernel: tpu_custom_call.1
= control target key start
LH: loop header
LB: loop body
LE: loop exit
PB: predicated region body
PF: predicated region fallthrough
CT: control target
= control target key end

     0   :  { %8 = vsyncpa [#allocation3], 0  ;;  %s405_s0 = inlined_call_operand.hbm [shape: f32[16,128], index: 0, kind: input, shape index: {}]   ;;  %s406_s1 = inlined_call_operand.hbm [shape: f32[16,128], index: 1, kind: input, shape index: {}]   ;;  %s407_s2 = inlined_call_operand.hbm [shape: f32[16,128], index: 2, kind: input, shape index: {}]   ;;  %s408_s3 = inlined_call_operand.hbm [shape: f32[1,8,128], index: 3, kind: output, shape index: {}]  }
   0x1   :  { %9 = vsyncpa [#allocation6], 0 }
   0x2   :  { %10 = vsyncpa [#allocation4], 0  ;;  %s315_s12 = smov [#allocation5]   ;;  %s316_s14 = smov [#allocation2]  }
   0x3   :  { %s40_s13 = sshll.u32 %s315_s12, 4  ;;  %s22_s15 = sshll.u32 %s316_s14, 4  ;;  %s41_s13 = int_to_ptr.vmem [resolvable:$true] %s40_s13  ;;  %s341_s15 = int_to_ptr.vmem [resolvable:$true] %s22_s15 }
   0x4   :  { %s221_s18 = scalar_lea.hbm %s406_s1, 256 }
   0x5   :  { %p222_p0 = scmp.ne.s32.totalorder %s406_s1, %s221_s18  ;;  %p225_p1 = scmp.lt.u32.totalorder %s221_s18, %s406_s1 }
   0x7   :  { %p227_p2 = pnand %p225_p1, %p222_p0 }
   0x9   :  { %230 = shalt.err (!%p227_p2)
}
   0xa   :  { %s231_s23 = scalar_lea.vmem %s41_s13, 256  ;;  %p236_p4 = scmp.lt.s32.totalorder %s41_s13, %s41_s13 }
   0xb   :  { %p232_p3 = scmp.ne.s32.totalorder %s41_s13, %s231_s23  ;;  %p237_p5 = scmp.lt.s32.totalorder %s231_s23, %s231_s23 }
   0xd   :  { %p238_p6 = por %p237_p5, %p236_p4 }
   0xf   :  { %p239_p7 = pnand %p238_p6, %p232_p3 }
  0x11   :  { %242 = shalt.err (!%p239_p7)
}
  0x12   :  { %s317_s24 = smov 128   ;;  %s318_s25 = smov 8  }
  0x13   :  { %46 = dma.hbm_to_vmem [thread:$0]  %s406_s1, 256, %s41_s13, [#allocation6], %s317_s24, %s317_s24, %s318_s25  }
  0x14   :  { %s243_s30 = scalar_lea.hbm %s405_s0, 256 }
  0x15   :  { %p244_p8 = scmp.ne.s32.totalorder %s405_s0, %s243_s30  ;;  %p247_p9 = scmp.lt.u32.totalorder %s243_s30, %s405_s0 }
  0x17   :  { %p249_p10 = pnand %p247_p9, %p244_p8 }
  0x19   :  { %252 = shalt.err (!%p249_p10)
}
  0x1a   :  { %s253_s8 = scalar_lea.vmem %s341_s15, 256  ;;  %p258_p12 = scmp.lt.s32.totalorder %s341_s15, %s341_s15 }
  0x1b   :  { %p254_p11 = scmp.ne.s32.totalorder %s341_s15, %s253_s8  ;;  %p259_p13 = scmp.lt.s32.totalorder %s253_s8, %s253_s8 }
  0x1d   :  { %p260_p0 = por %p259_p13, %p258_p12 }
  0x1f   :  { %p261_p1 = pnand %p260_p0, %p254_p11 }
  0x21   :  { %264 = shalt.err (!%p261_p1)
}
  0x22   :  { %28 = dma.hbm_to_vmem [thread:$0]  %s405_s0, 256, %s341_s15, [#allocation3], %s317_s24, %s317_s24, %s318_s25  }
  0x23   :  { %s319_s10 = smov [#allocation7]   ;;  %s265_s14 = scalar_lea.hbm %s407_s2, 256 }
  0x24   :  { %s58_s11 = sshll.u32 %s319_s10, 4  ;;  %p266_p2 = scmp.ne.s32.totalorder %s407_s2, %s265_s14  ;;  %s59_s11 = int_to_ptr.vmem [resolvable:$true] %s58_s11 }
  0x25   :  { %p269_p3 = scmp.lt.u32.totalorder %s265_s14, %s407_s2 }
  0x27   :  { %p271_p4 = pnand %p269_p3, %p266_p2 }
  0x29   :  { %274 = shalt.err (!%p271_p4)
}
  0x2a   :  { %s275_s20 = scalar_lea.vmem %s59_s11, 256  ;;  %p280_p6 = scmp.lt.s32.totalorder %s59_s11, %s59_s11 }
  0x2b   :  { %p276_p5 = scmp.ne.s32.totalorder %s59_s11, %s275_s20  ;;  %p281_p7 = scmp.lt.s32.totalorder %s275_s20, %s275_s20 }
  0x2d   :  { %p282_p8 = por %p281_p7, %p280_p6 }
  0x2f   :  { %p283_p9 = pnand %p282_p8, %p276_p5 }
  0x31   :  { %286 = shalt.err (!%p283_p9)
}
  0x32   :  { %64 = dma.hbm_to_vmem [thread:$0]  %s407_s2, 256, %s59_s11, [#allocation6], %s317_s24, %s317_s24, %s318_s25  }
  0x33   :  { %309 = dma.done.wait [#allocation3], 256  }
  0x34   :  { %310 = vsyncadd [#allocation3], 4294967040 }
  0x35   :  { %311 = dma.done.wait [#allocation6], 512  }
  0x36   :  { %312 = vsyncadd [#allocation6], 4294966784  ;;  %v98_v0 = vld [vmem:[#allocation2] sm:$0xff]  ;;  %v99_v1 = vld [vmem:[#allocation2 + $0x8] sm:$0xff]  ;;  %s320_s2 = smov [#allocation8]  }
  0x37   :  { %v106_v2 = vadd.f32 1e-08, %v98_v0  ;;  %v107_v3 = vadd.f32 1e-08, %v99_v1  ;;  %v116_v4 = vsub.f32 1.0, %v98_v0  ;;  %v117_v5 = vsub.f32 1.0, %v99_v1 }
  0x38   :  { %v100_v8 = vld [vmem:[#allocation5] sm:$0xff]  ;;  %v101_v9 = vld [vmem:[#allocation5 + $0x8] sm:$0xff]  ;;  %v102_v25 = vld [vmem:[#allocation7] sm:$0xff]  ;;  %s190_s21 = sshll.u32 %s320_s2, 4  ;;  %s191_s21 = int_to_ptr.vmem [resolvable:$true] %s190_s21 }
  0x39   :  { %213 = vlog2.f32 %v106_v2  ;;  %v118_v6 = vadd.f32 1e-08, %v116_v4  ;;  %v119_v7 = vadd.f32 1e-08, %v117_v5  ;;  %v104_v12 = vsub.f32 0.0, %v100_v8  ;;  %v103_v27 = vld [vmem:[#allocation7 + $0x8] sm:$0xff]  ;;  %p292_p11 = scmp.lt.s32.totalorder %s191_s21, %s191_s21 }
  0x3a   :  { %215 = vlog2.f32 %v107_v3  ;;  %v105_v14 = vsub.f32 0.0, %v101_v9  ;;  %v114_v16 = vsub.f32 1.0, %v100_v8  ;;  %v115_v18 = vsub.f32 1.0, %v101_v9  ;;  %s287_s22 = scalar_lea.vmem %s191_s21, 128 }
  0x3b   :  { %217 = vlog2.f32 %v118_v6  ;;  %p288_p10 = scmp.ne.s32.totalorder %s191_s21, %s287_s22  ;;  %p293_p12 = scmp.lt.s32.totalorder %s287_s22, %s287_s22 }
  0x3c   :  { %219 = vlog2.f32 %v119_v7 }
  0x3d   :  { %p294_p13 = por %p293_p12, %p292_p11 }
  0x3f   :  { %p295_p0 = pnand %p294_p13, %p288_p10 }
  0x43   :  { %v214_v10 = vpop.eup %213 }
  0x44   :  { %v216_v11 = vpop.eup %215  ;;  %v109_v13 = vmul.f32 0.6931472, %v214_v10 }
  0x45   :  { %v111_v15 = vmul.f32 0.6931472, %v216_v11  ;;  %v218_v17 = vpop.eup %217 }
  0x46   :  { %v220_v19 = vpop.eup %219  ;;  %v112_v20 = vmul.f32 %v109_v13, %v104_v12  ;;  %v121_v21 = vmul.f32 0.6931472, %v218_v17 }
  0x47   :  { %v113_v22 = vmul.f32 %v111_v15, %v105_v14  ;;  %v123_v23 = vmul.f32 0.6931472, %v220_v19 }
  0x48   :  { %v124_v24 = vmul.f32 %v121_v21, %v114_v16 }
  0x49   :  { %v125_v26 = vmul.f32 %v123_v23, %v115_v18 }
  0x4a   :  { %v126_v28 = vsub.f32 %v112_v20, %v124_v24 }
  0x4b   :  { %v127_v29 = vsub.f32 %v113_v22, %v125_v26 }
  0x4c   :  { %v128_v30 = vmul.f32 %v126_v28, %v102_v25 }
  0x4d   :  { %v129_v31 = vmul.f32 %v127_v29, %v103_v27 }
  0x4f   :  { %v130_v32 = vadd.f32 %v129_v31, %v128_v30 }
  0x51   :  { %133 = vst [vmem:[#allocation8] sm:$0xff] %v130_v32 }
  0x52   :  { %298 = shalt.err (!%p295_p0)
}
  0x53   :  { %s299_s25 = scalar_lea.hbm %s408_s3, 128 }
  0x54   :  { %p300_p1 = scmp.ne.s32.totalorder %s408_s3, %s299_s25  ;;  %p303_p2 = scmp.lt.u32.totalorder %s299_s25, %s408_s3 }
  0x56   :  { %p305_p3 = pnand %p303_p2, %p300_p1 }
  0x58   :  { %308 = shalt.err (!%p305_p3)
}
  0x59   :  { %193 = dma.vmem_to_hbm [thread:$0]  %s191_s21, 128, %s408_s3, [#allocation4]  }
  0x5a   :  { %313 = dma.done.wait [#allocation4], 128  }
  0x5b   :  { %314 = vsyncadd [#allocation4], 4294967168 }
  0x5c   :  { %197 = vsyncpa [#allocation3], 1 }
  0x5d   :  { %198 = vsyncpa [#allocation6], 1 }
  0x5e   :  { %199 = vsyncpa [#allocation4], 1 }

</bundles_post_ra>
